<compile_context>
chip_gen: v7x
topology: tpu7x:2x2x1
jax: 0.10.0
libtpu: 0.0.40
codegen_flags: <defaults>
</compile_context>

<pallas_src>
import functools

import jax
import jax.numpy as jnp
import numpy as np
from jax.experimental import pallas as pl
from jax.experimental.pallas import tpu as pltpu


# Streaming-tile caps: <= 512 x 1024 f32-equivalent (2 MiB) per tile, so the
# fused pass-2 working set (2 arrays x 2 buffers + (8, tile_c) accumulators)
# stays under ~10 MiB -- inside scoped VMEM on v5e/v6e/v7x with the explicit
# limit below.
_ROW_TILE_MAX = 512
_COL_TILE_MAX = 1024
_ROW_SPLIT_MIN = 256          # force >= 2 row tiles (v7x megacore) above this
_SUBLANE = 8
_ROW_ALIGN = 16               # bf16 sublane packing
_LANE = 128

_SMALL_PATH_F32_BYTES = 4 * 1024 * 1024    # single-block path below this
_STREAM_VMEM_LIMIT = 24 * 1024 * 1024
_SMALL_VMEM_LIMIT = 32 * 1024 * 1024


def _round_up(x, m):
    return (x + m - 1) // m * m


def _pick_tiles(n_rows, n_cols):
    """Balanced, shape-aware tiles (lane-dense columns, aligned rows)."""
    n_row_tiles = pl.cdiv(n_rows, _ROW_TILE_MAX)
    if n_rows >= _ROW_SPLIT_MIN:
        n_row_tiles = max(n_row_tiles, 2)    # keep both v7x TCs busy
    tile_r = min(_round_up(pl.cdiv(n_rows, n_row_tiles), _ROW_ALIGN),
                 _round_up(n_rows, _ROW_ALIGN))
    n_col_tiles = pl.cdiv(n_cols, _COL_TILE_MAX)
    tile_c = min(_round_up(pl.cdiv(n_cols, n_col_tiles), _LANE),
                 _round_up(n_cols, _LANE))
    return tile_r, tile_c


def _mask_oob(term, i, j, n_rows, n_cols, tile_r, tile_c):
    """Zero out-of-bounds lanes of boundary tiles (select, never multiply)."""
    if (n_rows % tile_r == 0) and (n_cols % tile_c == 0):
        return term
    row = jax.lax.broadcasted_iota(jnp.int32, (tile_r, tile_c), 0) + i * tile_r
    col = jax.lax.broadcasted_iota(jnp.int32, (tile_r, tile_c), 1) + j * tile_c
    return jnp.where((row < n_rows) & (col < n_cols), term, 0.0)


def _fold_sublanes(term, tile_r, tile_c):
    """(tile_r, tile_c) -> (8, tile_c) via VPU adds (no cross-lane movement)."""
    return jnp.sum(term.reshape(tile_r // _SUBLANE, _SUBLANE, tile_c), axis=0)


# ---------------------------------------------------------------------------
# Small path: whole arrays live in VMEM as single blocks (one kernel call).
# ---------------------------------------------------------------------------
def _nce_loss_small_kernel(pos_ref, neg_ref, out_ref):
    pos = pos_ref[...].astype(jnp.float32)     # (B, P)
    neg = neg_ref[...].astype(jnp.float32)     # (B, K)
    B = pos.shape[0]
    K = neg.shape[1]

    u_neg = jnp.exp(neg)
    # Partition function: K * mean(exp(negatives)) over ALL elements.
    k_avg = K * jnp.mean(u_neg)
    log_k_avg = jnp.log(k_avg)

    # Divide-free log identities (no reciprocal on the EUP):
    ln_pmt = jnp.log(jnp.exp(pos) + k_avg) - pos        # -log(Pmt), (B, P)
    ln_pon = jnp.log(u_neg + k_avg) - log_k_avg         # -log(Pon), (B, K)

    # mean_b[ mean_p(-log Pmt) + sum_k(-log Pon) ]
    loss = jnp.mean(ln_pmt) + jnp.sum(ln_pon) / B
    out_ref[...] = jnp.full((1, 1), loss, dtype=jnp.float32)


# ---------------------------------------------------------------------------
# Large path, pass 1: streamed sum(exp(negatives)).
# ---------------------------------------------------------------------------
def _exp_sum_kernel(x_ref, out_ref, acc_ref, *, n_rows, n_cols, tile_r, tile_c):
    i = pl.program_id(0)          # row-tile axis ("parallel")
    j = pl.program_id(1)          # col-tile axis (reduction, "arbitrary")

    term = jnp.exp(x_ref[...].astype(jnp.float32))
    term = _mask_oob(term, i, j, n_rows, n_cols, tile_r, tile_c)
    partial = _fold_sublanes(term, tile_r, tile_c)

    @pl.when(j == 0)
    def _():
        acc_ref[...] = partial

    @pl.when(j > 0)
    def _():
        acc_ref[...] += partial

    @pl.when(j == pl.num_programs(1) - 1)
    def _():
        out_ref[...] = jnp.full((1, 1, 1), jnp.sum(acc_ref[...]),
                                dtype=jnp.float32)


def _tiled_exp_sum(x):
    n_rows, n_cols = x.shape
    tile_r, tile_c = _pick_tiles(n_rows, n_cols)
    grid = (pl.cdiv(n_rows, tile_r), pl.cdiv(n_cols, tile_c))
    kernel = functools.partial(_exp_sum_kernel, n_rows=n_rows, n_cols=n_cols,
                               tile_r=tile_r, tile_c=tile_c)
    cost = pl.CostEstimate(
        flops=2 * int(x.size),
        transcendentals=int(x.size),
        bytes_accessed=int(x.size) * x.dtype.itemsize + 4 * grid[0])
    partials = pl.pallas_call(
        kernel,
        out_shape=jax.ShapeDtypeStruct((grid[0], 1, 1), jnp.float32),
        grid_spec=pltpu.PrefetchScalarGridSpec(
            num_scalar_prefetch=0,
            grid=grid,
            in_specs=[pl.BlockSpec((tile_r, tile_c), lambda i, j: (i, j))],
            out_specs=pl.BlockSpec((1, 1, 1), lambda i, j: (i, 0, 0)),
            scratch_shapes=[pltpu.VMEM((_SUBLANE, tile_c), jnp.float32)],
        ),
        compiler_params=pltpu.CompilerParams(
            dimension_semantics=("parallel", "arbitrary"),
            vmem_limit_bytes=_STREAM_VMEM_LIMIT),
        cost_estimate=cost,
    )(x)
    return jnp.sum(partials)


# ---------------------------------------------------------------------------
# Large path, pass 2 (fused): stream positives AND negatives in one call.
# ---------------------------------------------------------------------------
def _pass2_kernel(c_ref, pos_ref, neg_ref, pos_out_ref, neg_out_ref,
                  pos_acc, neg_acc, *, n_rows, p_cols, k_cols,
                  tile_r, tp_c, tk_c, n_p_tiles, n_k_tiles):
    i = pl.program_id(0)          # row-tile axis ("parallel")
    j = pl.program_id(1)          # col-tile axis (reduction, "arbitrary")
    k_avg = c_ref[0, 0]

    # positives:  -log(Pmt) = log(exp(pos) + K*avg) - pos
    @pl.when(j < n_p_tiles)
    def _():
        x = pos_ref[...].astype(jnp.float32)
        term = jnp.log(jnp.exp(x) + k_avg) - x
        term = _mask_oob(term, i, j, n_rows, p_cols, tile_r, tp_c)
        partial = _fold_sublanes(term, tile_r, tp_c)

        @pl.when(j == 0)
        def _():
            pos_acc[...] = partial

        @pl.when(j > 0)
        def _():
            pos_acc[...] += partial

    # negatives:  -log(Pon) + log(K*avg) = log(exp(neg) + K*avg)
    @pl.when(j < n_k_tiles)
    def _():
        x = neg_ref[...].astype(jnp.float32)
        term = jnp.log(jnp.exp(x) + k_avg)
        term = _mask_oob(term, i, j, n_rows, k_cols, tile_r, tk_c)
        partial = _fold_sublanes(term, tile_r, tk_c)

        @pl.when(j == 0)
        def _():
            neg_acc[...] = partial

        @pl.when(j > 0)
        def _():
            neg_acc[...] += partial

    @pl.when(j == pl.num_programs(1) - 1)
    def _():
        pos_out_ref[...] = jnp.full((1, 1, 1), jnp.sum(pos_acc[...]),
                                    dtype=jnp.float32)
        neg_out_ref[...] = jnp.full((1, 1, 1), jnp.sum(neg_acc[...]),
                                    dtype=jnp.float32)


def _fused_pass2_sums(positives, negatives, k_avg):
    n_rows, p_cols = positives.shape
    _, k_cols = negatives.shape
    tile_r, tp_c = _pick_tiles(n_rows, p_cols)
    _, tk_c = _pick_tiles(n_rows, k_cols)
    gr = pl.cdiv(n_rows, tile_r)
    n_p_tiles = pl.cdiv(p_cols, tp_c)
    n_k_tiles = pl.cdiv(k_cols, tk_c)
    gc = max(n_p_tiles, n_k_tiles)

    kernel = functools.partial(
        _pass2_kernel, n_rows=n_rows, p_cols=p_cols, k_cols=k_cols,
        tile_r=tile_r, tp_c=tp_c, tk_c=tk_c,
        n_p_tiles=n_p_tiles, n_k_tiles=n_k_tiles)

    n_elem = int(positives.size) + int(negatives.size)
    cost = pl.CostEstimate(
        flops=4 * n_elem,
        transcendentals=2 * n_elem,
        bytes_accessed=(int(positives.size) * positives.dtype.itemsize
                        + int(negatives.size) * negatives.dtype.itemsize
                        + 8 * gr + 4))

    # Column index maps clamp once an array runs out of column tiles; an
    # unchanged block index between consecutive grid steps issues no new DMA,
    # so each array is still read from HBM exactly once.
    pos_sums, neg_sums = pl.pallas_call(
        kernel,
        out_shape=(jax.ShapeDtypeStruct((gr, 1, 1), jnp.float32),
                   jax.ShapeDtypeStruct((gr, 1, 1), jnp.float32)),
        grid_spec=pltpu.PrefetchScalarGridSpec(
            num_scalar_prefetch=0,
            grid=(gr, gc),
            in_specs=[
                # k_avg scalar, resident in SMEM.
                pl.BlockSpec(memory_space=pltpu.MemorySpace.SMEM),
                pl.BlockSpec((tile_r, tp_c),
                             lambda i, j: (i, jnp.minimum(j, n_p_tiles - 1))),
                pl.BlockSpec((tile_r, tk_c),
                             lambda i, j: (i, jnp.minimum(j, n_k_tiles - 1))),
            ],
            out_specs=[pl.BlockSpec((1, 1, 1), lambda i, j: (i, 0, 0)),
                       pl.BlockSpec((1, 1, 1), lambda i, j: (i, 0, 0))],
            scratch_shapes=[pltpu.VMEM((_SUBLANE, tp_c), jnp.float32),
                            pltpu.VMEM((_SUBLANE, tk_c), jnp.float32)],
        ),
        compiler_params=pltpu.CompilerParams(
            dimension_semantics=("parallel", "arbitrary"),
            vmem_limit_bytes=_STREAM_VMEM_LIMIT),
        cost_estimate=cost,
    )(jnp.asarray(k_avg, jnp.float32).reshape(1, 1), positives, negatives)
    return jnp.sum(pos_sums), jnp.sum(neg_sums)


def _nce_loss_large(positives, negatives):
    B, P = positives.shape
    _, K = negatives.shape
    # Pass 1: partition function K * mean(exp(negatives)) = sum(exp(neg)) / B.
    sum_exp_neg = _tiled_exp_sum(negatives)
    k_avg = sum_exp_neg / B
    log_k_avg = jnp.log(k_avg)
    # Pass 2 (fused): stream positives and negatives once with k_avg fixed.
    pos_sum, neg_sum = _fused_pass2_sums(positives, negatives, k_avg)
    ln_pmt_mean = pos_sum / (B * P)                     # mean_b mean_p -log(Pmt)
    ln_pon_mean = (neg_sum - (B * K) * log_k_avg) / B   # mean_b sum_k  -log(Pon)
    return ln_pmt_mean + ln_pon_mean


# ---------------------------------------------------------------------------
# Public wrapper with shape-based dispatch.
# ---------------------------------------------------------------------------
def nce_loss(positives: jax.Array, negatives: jax.Array) -> jax.Array:
    """Pallas NCE loss. positives: (B, P), negatives: (B, K) -> scalar f32."""
    assert positives.ndim == 2 and negatives.ndim == 2
    assert positives.shape[0] == negatives.shape[0]
    n_elem = int(positives.size) + int(negatives.size)
    if 4 * n_elem <= _SMALL_PATH_F32_BYTES:
        cost = pl.CostEstimate(
            flops=4 * n_elem,
            transcendentals=2 * n_elem,
            bytes_accessed=(int(positives.size) * positives.dtype.itemsize
                            + int(negatives.size) * negatives.dtype.itemsize + 4))
        out = pl.pallas_call(
            _nce_loss_small_kernel,
            out_shape=jax.ShapeDtypeStruct((1, 1), jnp.float32),
            in_specs=[pl.BlockSpec(memory_space=pltpu.MemorySpace.VMEM),
                      pl.BlockSpec(memory_space=pltpu.MemorySpace.VMEM)],
            out_specs=pl.BlockSpec(memory_space=pltpu.MemorySpace.VMEM),
            compiler_params=pltpu.CompilerParams(
                vmem_limit_bytes=_SMALL_VMEM_LIMIT),
            cost_estimate=cost,
        )(positives, negatives)
        return out[0, 0]
    return _nce_loss_large(positives, negatives)


def nce_loss_ref(positives: jax.Array, negatives: jax.Array) -> jax.Array:
    """Pure-JAX reference mirroring the PyTorch forward (first-call semantics)."""
    K = negatives.shape[1]
    u_pos = jnp.exp(positives)
    u_neg = jnp.exp(negatives)
    avg = jnp.mean(u_neg)
    pmt = u_pos / (u_pos + K * avg)
    ln_pmt = -jnp.mean(jnp.log(pmt), axis=-1)
    pon = (K * avg) / (u_neg + K * avg)
    ln_pon = -jnp.sum(jnp.log(pon), axis=-1)
    return jnp.mean(ln_pmt + ln_pon)


if __name__ == "__main__":
    key = jax.random.PRNGKey(0)
    k1, k2, k3, k4 = jax.random.split(key, 4)

    # --- Small-path test (single VMEM block) -------------------------------
    B, P, K = 8, 128, 128
    pos_s = jax.random.normal(k1, (B, P), dtype=jnp.float32)
    neg_s = jax.random.normal(k2, (B, K), dtype=jnp.float32)
    loss_s = nce_loss(pos_s, neg_s)
    jax.block_until_ready(loss_s)
    np.testing.assert_allclose(np.asarray(loss_s),
                               np.asarray(nce_loss_ref(pos_s, neg_s)),
                               rtol=1e-5, atol=1e-5)

    # --- Gridded two-pass path (smallest shape that exceeds the small-path
    #     cutoff; bf16 ingress, ragged row/column tiles, fused pass 2) -------
    B2, P2, K2 = 300, 384, 3300
    pos_l = jax.random.normal(k3, (B2, P2), dtype=jnp.float32).astype(jnp.bfloat16)
    neg_l = jax.random.normal(k4, (B2, K2), dtype=jnp.float32).astype(jnp.bfloat16)
    loss_l = nce_loss(pos_l, neg_l)
    jax.block_until_ready(loss_l)
    ref_l = nce_loss_ref(pos_l.astype(jnp.float32), neg_l.astype(jnp.float32))
    np.testing.assert_allclose(np.asarray(loss_l), np.asarray(ref_l),
                               rtol=2e-4, atol=2e-4)

    print("KERNEL_OK")
</pallas_src>

<mosaic_0001>
module attributes {stable_mosaic.version = 11 : i64} {
  func.func @_nce_loss_small_kernel(%arg0: memref<8x128xf32, #tpu.memory_space<vmem>>, %arg1: memref<8x128xf32, #tpu.memory_space<vmem>>, %arg2: memref<1x1xf32, #tpu.memory_space<vmem>>) attributes {dimension_semantics = [], scalar_prefetch = 0 : i64, scratch_operands = 0 : i64, tpu.core_type = #tpu.core_type<tc>} {
    %c0 = arith.constant 0 : index
    %c0_0 = arith.constant 0 : index
    %0 = vector.load %arg0[%c0, %c0_0] : memref<8x128xf32, #tpu.memory_space<vmem>>, vector<8x128xf32>
    %c0_1 = arith.constant 0 : index
    %c0_2 = arith.constant 0 : index
    %1 = vector.load %arg1[%c0_1, %c0_2] : memref<8x128xf32, #tpu.memory_space<vmem>>, vector<8x128xf32>
    %2 = math.exp %1 : vector<8x128xf32>
    %3 = vector.shape_cast %2 : vector<8x128xf32> to vector<1x8x128xf32>
    %cst = arith.constant dense<0.000000e+00> : vector<1xf32>
    %4 = vector.multi_reduction <add>, %3, %cst [1, 2] : vector<1x8x128xf32> to vector<1xf32>
    %5 = vector.shape_cast %4 : vector<1xf32> to vector<1x1x1xf32>
    %6 = vector.extract %5[0, 0, 0] : f32 from vector<1x1x1xf32>
    %cst_3 = arith.constant 1.024000e+03 : f32
    %7 = arith.divf %6, %cst_3 : f32
    %cst_4 = arith.constant 1.280000e+02 : f32
    %8 = arith.mulf %cst_4, %7 : f32
    %9 = math.log %8 : f32
    %10 = math.exp %0 : vector<8x128xf32>
    %11 = vector.broadcast %8 : f32 to vector<8x128xf32>
    %12 = arith.addf %10, %11 : vector<8x128xf32>
    %13 = math.log %12 : vector<8x128xf32>
    %14 = arith.subf %13, %0 : vector<8x128xf32>
    %15 = vector.broadcast %8 : f32 to vector<8x128xf32>
    %16 = arith.addf %2, %15 : vector<8x128xf32>
    %17 = math.log %16 : vector<8x128xf32>
    %18 = vector.broadcast %9 : f32 to vector<8x128xf32>
    %19 = arith.subf %17, %18 : vector<8x128xf32>
    %20 = vector.shape_cast %14 : vector<8x128xf32> to vector<1x8x128xf32>
    %cst_5 = arith.constant dense<0.000000e+00> : vector<1xf32>
    %21 = vector.multi_reduction <add>, %20, %cst_5 [1, 2] : vector<1x8x128xf32> to vector<1xf32>
    %22 = vector.shape_cast %21 : vector<1xf32> to vector<1x1x1xf32>
    %23 = vector.extract %22[0, 0, 0] : f32 from vector<1x1x1xf32>
    %cst_6 = arith.constant 1.024000e+03 : f32
    %24 = arith.divf %23, %cst_6 : f32
    %25 = vector.shape_cast %19 : vector<8x128xf32> to vector<1x8x128xf32>
    %cst_7 = arith.constant dense<0.000000e+00> : vector<1xf32>
    %26 = vector.multi_reduction <add>, %25, %cst_7 [1, 2] : vector<1x8x128xf32> to vector<1xf32>
    %27 = vector.shape_cast %26 : vector<1xf32> to vector<1x1x1xf32>
    %28 = vector.extract %27[0, 0, 0] : f32 from vector<1x1x1xf32>
    %cst_8 = arith.constant 8.000000e+00 : f32
    %29 = arith.divf %28, %cst_8 : f32
    %30 = arith.addf %24, %29 : f32
    %31 = vector.broadcast %30 : f32 to vector<1x1xf32>
    %c0_9 = arith.constant 0 : index
    %c0_10 = arith.constant 0 : index
    %32 = vector.load %arg2[%c0_9, %c0_10] : memref<1x1xf32, #tpu.memory_space<vmem>>, vector<1x1xf32>
    tpu.vector_store %arg2[%c0_9, %c0_10], %31 {strides = array<i32>} : memref<1x1xf32, #tpu.memory_space<vmem>>, vector<1x1xf32>,
    return
  }
}

</mosaic_0001>

<bundles_post_ra>
// kernel: tpu_custom_call.1
= control target key start
LH: loop header
LB: loop body
LE: loop exit
PB: predicated region body
PF: predicated region fallthrough
CT: control target
= control target key end

     0   :  { %7 = vsyncpa [#allocation3], 0  ;;  %s260_s0 = inlined_call_operand.hbm [shape: f32[8,128], index: 0, kind: input, shape index: {}]   ;;  %s261_s1 = inlined_call_operand.hbm [shape: f32[8,128], index: 1, kind: input, shape index: {}]   ;;  %s262_s2 = inlined_call_operand.hbm [shape: f32[1,1], index: 2, kind: output, shape index: {}]  }
   0x1   :  { %8 = vsyncpa [#allocation6], 0 }
   0x2   :  { %9 = vsyncpa [#allocation4], 0  ;;  %s206_s9 = smov [#allocation2]   ;;  %s207_s11 = smov [#allocation5]  }
   0x3   :  { %s16_s10 = sshll.u32 %s206_s9, 4  ;;  %s26_s12 = sshll.u32 %s207_s11, 4  ;;  %s17_s10 = int_to_ptr.vmem [resolvable:$true] %s16_s10  ;;  %s27_s12 = int_to_ptr.vmem [resolvable:$true] %s26_s12 }
   0x4   :  { %s134_s15 = scalar_lea.hbm %s260_s0, 128 }
   0x5   :  { %p135_p0 = scmp.ne.s32.totalorder %s260_s0, %s134_s15  ;;  %p138_p1 = scmp.lt.u32.totalorder %s134_s15, %s260_s0 }
   0x7   :  { %p140_p2 = pnand %p138_p1, %p135_p0 }
   0x9   :  { %143 = shalt.err (!%p140_p2)
}
   0xa   :  { %s144_s20 = scalar_lea.vmem %s17_s10, 128  ;;  %p149_p4 = scmp.lt.s32.totalorder %s17_s10, %s17_s10 }
   0xb   :  { %p145_p3 = scmp.ne.s32.totalorder %s17_s10, %s144_s20  ;;  %p150_p5 = scmp.lt.s32.totalorder %s144_s20, %s144_s20 }
   0xd   :  { %p151_p6 = por %p150_p5, %p149_p4 }
   0xf   :  { %p152_p7 = pnand %p151_p6, %p145_p3 }
  0x11   :  { %155 = shalt.err (!%p152_p7)
}
  0x12   :  { %19 = dma.hbm_to_vmem [thread:$0]  %s260_s0, 128, %s17_s10, [#allocation3]  }
  0x13   :  { %s156_s25 = scalar_lea.hbm %s261_s1, 128 }
  0x14   :  { %p157_p8 = scmp.ne.s32.totalorder %s261_s1, %s156_s25  ;;  %p160_p9 = scmp.lt.u32.totalorder %s156_s25, %s261_s1 }
  0x16   :  { %p162_p10 = pnand %p160_p9, %p157_p8 }
  0x18   :  { %165 = shalt.err (!%p162_p10)
}
  0x19   :  { %s166_s30 = scalar_lea.vmem %s27_s12, 128  ;;  %p171_p12 = scmp.lt.s32.totalorder %s27_s12, %s27_s12 }
  0x1a   :  { %p167_p11 = scmp.ne.s32.totalorder %s27_s12, %s166_s30  ;;  %p172_p13 = scmp.lt.s32.totalorder %s166_s30, %s166_s30 }
  0x1c   :  { %p173_p0 = por %p172_p13, %p171_p12 }
  0x1e   :  { %p174_p1 = pnand %p173_p0, %p167_p11 }
  0x20   :  { %177 = shalt.err (!%p174_p1)
}
  0x21   :  { %29 = dma.hbm_to_vmem [thread:$0]  %s261_s1, 128, %s27_s12, [#allocation6]  }
  0x22   :  { %200 = dma.done.wait [#allocation3], 128  }
  0x23   :  { %201 = vsyncadd [#allocation3], 4294967168 }
  0x24   :  { %202 = dma.done.wait [#allocation6], 128  }
  0x25   :  { %203 = vsyncadd [#allocation6], 4294967168  ;;  %v37_v0 = vld [vmem:[#allocation5] sm:$0xff]  ;;  %v36_v10 = vld [vmem:[#allocation2] sm:$0xff]  ;;  %s208_s11 = smov [#allocation7]   ;;  %vm95_vm0 = vcmask 0  }
  0x26   :  { %v38_v1 = vmul.f32 1.442695, %v37_v0  ;;  %v57_v11 = vmul.f32 1.442695, %v36_v10  ;;  %s103_s12 = sshll.u32 %s208_s11, 4  ;;  %s104_s12 = int_to_ptr.vmem [resolvable:$true] %s103_s12 }
  0x27   :  { %s178_s14 = scalar_lea.vmem %s104_s12, 16  ;;  %s182_s15 = scalar_lea.vmem %s104_s12, 32 }
  0x28   :  { %124 = vpow2.f32 %v38_v1  ;;  %p179_p2 = scmp.ne.s32.totalorder %s104_s12, %s178_s14  ;;  %p183_p3 = scmp.lt.s32.totalorder %s104_s12, %s104_s12 }
  0x29   :  { %126 = vpow2.f32 %v57_v11  ;;  %p184_p4 = scmp.lt.s32.totalorder %s182_s15, %s178_s14 }
  0x2b   :  { %p185_p5 = por %p184_p4, %p183_p3 }
  0x2d   :  { %p186_p6 = pnand %p185_p5, %p179_p2 }
  0x32   :  { %v125_v2 = vpop.eup %124 }
  0x33   :  { %40 = vadd.xlane.f32.xlu0 %v125_v2  ;;  %v127_v12 = vpop.eup %126 }
  0xc0   :  { %v41_v3 = vpop.xlane.xlu0 %40 }
  0xc1   :  { %v42_v4 = vrot.slane %v41_v3, 4 }
  0xc3   :  { %v43_v5 = vadd.f32 %v42_v4, %v41_v3 }
  0xc5   :  { %v44_v6 = vrot.slane %v43_v5, 2 }
  0xc7   :  { %v45_v7 = vadd.f32 %v44_v6, %v43_v5 }
  0xc9   :  { %v46_v8 = vrot.slane %v45_v7, 1 }
  0xcb   :  { %v47_v9 = vadd.f32 %v46_v8, %v45_v7 }
  0xcd   :  { %113 = vpush %v47_v9 }
  0xfe   :  { %s114_s1 = spop %113 }
  0xff   :  { %s51_s4 = smul.f32 0.0009765625, %s114_s1 }
 0x101   :  { %s52_s5 = smul.f32 128.0, %s51_s4 }
 0x103   :  { %v53_v13 = vstv %s52_s5 }
 0x104   :  { %128 = vlog2.f32 %v53_v13  ;;  %v60_v14 = vadd.f32 %v127_v12, %v53_v13  ;;  %v64_v20 = vadd.f32 %v125_v2, %v53_v13 }
 0x106   :  { %130 = vlog2.f32 %v60_v14 }
 0x107   :  { %132 = vlog2.f32 %v64_v20 }
 0x10e   :  { %v129_v15 = vpop.eup %128 }
 0x10f   :  { %v55_v16 = vmul.f32 0.6931472, %v129_v15 }
 0x110   :  { %v131_v17 = vpop.eup %130 }
 0x111   :  { %115 = vpush %v55_v16  ;;  %v62_v18 = vmul.f32 0.6931472, %v131_v17  ;;  %v133_v21 = vpop.eup %132 }
 0x112   :  { %v66_v22 = vmul.f32 0.6931472, %v133_v21 }
 0x113   :  { %v63_v19 = vsub.f32 %v62_v18, %v36_v10 }
 0x115   :  { %69 = vadd.xlane.f32.xlu0 %v63_v19 }
 0x142   :  { %s116_s6 = spop %115 }
 0x143   :  { %v67_v23 = vstv %s116_s6 }
 0x144   :  { %v68_v24 = vsub.f32 %v66_v22, %v67_v23 }
 0x146   :  { %81 = vadd.xlane.f32.xlu1 %v68_v24 }
 0x1a2   :  { %v70_v25 = vpop.xlane.xlu0 %69 }
 0x1a3   :  { %v71_v26 = vrot.slane %v70_v25, 4 }
 0x1a5   :  { %v72_v27 = vadd.f32 %v71_v26, %v70_v25 }
 0x1a7   :  { %v73_v28 = vrot.slane %v72_v27, 2 }
 0x1a9   :  { %v74_v29 = vadd.f32 %v73_v28, %v72_v27 }
 0x1ab   :  { %v75_v30 = vrot.slane %v74_v29, 1 }
 0x1ad   :  { %v76_v31 = vadd.f32 %v75_v30, %v74_v29 }
 0x1af   :  { %117 = vpush %v76_v31 }
 0x1d3   :  { %v82_v32 = vpop.xlane.xlu1 %81 }
 0x1d4   :  { %v83_v33 = vrot.slane %v82_v32, 4 }
 0x1d6   :  { %v84_v34 = vadd.f32 %v83_v33, %v82_v32 }
 0x1d8   :  { %v85_v35 = vrot.slane %v84_v34, 2 }
 0x1da   :  { %v86_v36 = vadd.f32 %v85_v35, %v84_v34 }
 0x1dc   :  { %v87_v37 = vrot.slane %v86_v36, 1 }
 0x1de   :  { %v88_v38 = vadd.f32 %v87_v37, %v86_v36 }
 0x1e0   :  { %119 = vpush %v88_v38  ;;  %s118_s7 = spop %117 }
 0x1e1   :  { %s80_s8 = smul.f32 0.0009765625, %s118_s7 }
 0x211   :  { %s120_s9 = spop %119 }
 0x212   :  { %s92_s10 = smul.f32 0.125, %s120_s9 }
 0x214   :  { %s93_s13 = sadd.f32 %s92_s10, %s80_s8 }
 0x216   :  { %v94_v39 = vstv %s93_s13 }
 0x217   :  { %96 = vst.msk [vmem:[#allocation7] sm:$0x1] %vm95_vm0, %v94_v39 }
 0x218   :  { %189 = shalt.err (!%p186_p6)
}
 0x219   :  { %s190_s18 = scalar_lea.hbm %s262_s2, 16 }
 0x21a   :  { %p191_p7 = scmp.ne.s32.totalorder %s262_s2, %s190_s18  ;;  %p194_p8 = scmp.lt.u32.totalorder %s190_s18, %s262_s2 }
 0x21c   :  { %p196_p9 = pnand %p194_p8, %p191_p7 }
 0x21e   :  { %199 = shalt.err (!%p196_p9)
}
 0x21f   :  { %106 = dma.vmem_to_hbm [thread:$0]  %s104_s12, 16, %s262_s2, [#allocation4]  }
 0x220   :  { %204 = dma.done.wait [#allocation4], 16  }
 0x221   :  { %205 = vsyncadd [#allocation4], 4294967280 }
 0x222   :  { %110 = vsyncpa [#allocation3], 1 }
 0x223   :  { %111 = vsyncpa [#allocation6], 1 }
 0x224   :  { %112 = vsyncpa [#allocation4], 1 }

</bundles_post_ra>
